<compile_context>
chip_gen: v5e
topology: v5e:2x2
jax: 0.10.0
libtpu: 0.0.40
codegen_flags: <defaults>
</compile_context>

<pallas_src>
import math

import jax
import jax.numpy as jnp
from jax import lax
from jax.experimental import pallas as pl
from jax.experimental.pallas import tpu as pltpu

INF = 10000000000.0  # matches the PyTorch module


# ----------------------------------------------------------------------------
# Tiling heuristics
# ----------------------------------------------------------------------------

def _chip_profile():
    """Returns (vmem_capacity_bytes_per_core, prefer_even_batch_grid)."""
    try:
        kind = jax.devices()[0].device_kind.lower()
    except Exception:
        kind = ""
    if "v7" in kind:
        return 64 * 1024 * 1024, True       # 2 TCs/chip share the parallel axis
    if "v4" in kind or "v5p" in kind:
        return 128 * 1024 * 1024, True      # megacore
    if "v5" in kind or "v6" in kind:
        return 128 * 1024 * 1024, False     # single TC: fewest grid steps wins
    return 64 * 1024 * 1024, False          # conservative default


def _pick_kv_tile(S, max_tile=512):
    """KV tile: full S when small, else largest 128-multiple divisor <= max_tile."""
    if S <= max_tile or S % 128:
        return S
    for cand in range(max_tile - max_tile % 128, 127, -128):
        if S % cand == 0:
            return cand
    return S


def _step_vmem_bytes(bt, T, ts, Dk, Dv, itemsize, has_mask):
    """Rough per-grid-step VMEM footprint (double-buffered tiles + temporaries)."""
    io = bt * T * Dk + bt * ts * (Dk + Dv) + bt * T * Dv
    total = 2 * io * itemsize                 # double-buffered in/out tiles
    if has_mask:
        total += 2 * bt * ts * 4              # mask tile (f32)
    total += bt * T * (Dv + 2) * 4            # m/l/acc scratch (f32)
    total += 3 * bt * T * ts * 4              # logits / p / select temporaries
    return total


def _pick_block_b(B, T, ts, Dk, Dv, itemsize, has_mask, budget, prefer_even):
    divisors = [d for d in range(1, B + 1) if B % d == 0]
    feasible = [d for d in divisors
                if _step_vmem_bytes(d, T, ts, Dk, Dv, itemsize, has_mask) <= budget]
    if not feasible:
        return 1
    if prefer_even:
        even = [d for d in feasible if (B // d) % 2 == 0]
        if even:
            return max(even)
    return max(feasible)


# ----------------------------------------------------------------------------
# Kernel
# ----------------------------------------------------------------------------

def _make_attention_kernel(inv_scale, causal_same_len, has_mask, kv_tile, precise):
    def kernel(*refs):
        if has_mask:
            q_ref, k_ref, v_ref, msk_ref, o_ref, m_sc, l_sc, acc_sc = refs
        else:
            q_ref, k_ref, v_ref, o_ref, m_sc, l_sc, acc_sc = refs
            msk_ref = None

        s_step = pl.program_id(1)

        @pl.when(s_step == 0)
        def _init():
            m_sc[...] = jnp.full(m_sc.shape, -jnp.inf, jnp.float32)
            l_sc[...] = jnp.zeros(l_sc.shape, jnp.float32)
            acc_sc[...] = jnp.zeros(acc_sc.shape, jnp.float32)

        # Scale folded into q: a (Bt,T,Dk) multiply instead of a (Bt,T,S) one,
        # and the -INF sentinel below stays un-scaled.
        q = q_ref[...] * inv_scale              # (Bt, T, Dk), compute dtype
        k = k_ref[...]                          # (Bt, ts, Dk)
        v = v_ref[...]                          # (Bt, ts, Dv)

        # ---- q @ k^T on the MXU, f32 accumulation ----
        dots = jnp.einsum('btd,bsd->bts', q, k,
                          preferred_element_type=jnp.float32)   # (Bt, T, ts)

        T = dots.shape[1]
        ts = dots.shape[2]

        # ---- combined padding (+ optional causal) mask, single select ----
        allowed = None
        if has_mask:
            allowed = msk_ref[...] > 0.0                         # (Bt, 1, ts)
        if causal_same_len:
            t_idx = lax.broadcasted_iota(jnp.int32, (T, ts), 0)
            s_idx = lax.broadcasted_iota(jnp.int32, (T, ts), 1) + s_step * kv_tile
            cmask = (s_idx <= t_idx)[None, :, :]                 # (1, T, ts)
            allowed = cmask if allowed is None else jnp.logical_and(allowed, cmask)

        if allowed is not None:
            logits = jnp.where(allowed, dots, jnp.float32(-INF))
        else:
            logits = dots

        # NOTE: rows with zero allowed keys get uniform attention over the
        # masked keys (documented divergence from the reference's raw softmax).

        # ---- online softmax over KV tiles ----
        m_prev = m_sc[...]
        m_new = jnp.maximum(m_prev, jnp.max(logits, axis=-1, keepdims=True))
        alpha = jnp.exp(m_prev - m_new)                          # (Bt, T, 1)
        p = jnp.exp(logits - m_new)                              # (Bt, T, ts)
        l_sc[...] = alpha * l_sc[...] + jnp.sum(p, axis=-1, keepdims=True)

        pv = jnp.einsum('bts,bsd->btd', p.astype(v.dtype), v,
                        preferred_element_type=jnp.float32)      # (Bt, T, Dv)
        acc_sc[...] = alpha * acc_sc[...] + pv
        m_sc[...] = m_new

        # ---- finalize: normalize AFTER the PV matmul ((Bt,T,Dv) multiply) ----
        @pl.when(s_step == pl.num_programs(1) - 1)
        def _finalize():
            l = l_sc[...]
            inv = pl.reciprocal(l, approx=True)                  # EUP slot
            if precise:
                inv = inv * (2.0 - l * inv)                      # one NR step (f32 path)
            o_ref[...] = (acc_sc[...] * inv).astype(o_ref.dtype)

    return kernel


# ----------------------------------------------------------------------------
# Wrapper
# ----------------------------------------------------------------------------

def attention_forward(query, key, value, mask=None, *, causal=False,
                      d_key=None, compute_dtype=jnp.bfloat16, kv_tile=512):
    """Pallas implementation of Attention.forward (3-D query path, value given)."""
    B, T, Dk = query.shape
    _, S, _ = key.shape
    Dv = value.shape[-1]
    if d_key is None:
        d_key = Dk
    inv_scale = 1.0 / math.sqrt(d_key)

    # bf16 I/O by default: halves HBM<->VMEM DMA, native-rate MXU; f32 accum.
    q = query.astype(compute_dtype)
    k = key.astype(compute_dtype)
    v = value.astype(compute_dtype)
    itemsize = jnp.dtype(compute_dtype).itemsize
    precise = jnp.dtype(compute_dtype) == jnp.dtype(jnp.float32)

    has_mask = mask is not None
    ts = _pick_kv_tile(S, kv_tile)

    vmem_cap, prefer_even = _chip_profile()
    vmem_limit = int(vmem_cap * 3 // 4)          # raise scoped default, keep headroom
    budget = int(vmem_limit * 3 // 5)
    bt = _pick_block_b(B, T, ts, Dk, Dv, itemsize, has_mask, budget, prefer_even)

    grid = (B // bt, S // ts)

    in_specs = [
        pl.BlockSpec((bt, T, Dk), lambda b, s: (b, 0, 0)),    # query (resident over s)
        pl.BlockSpec((bt, ts, Dk), lambda b, s: (b, s, 0)),   # key tile
        pl.BlockSpec((bt, ts, Dv), lambda b, s: (b, s, 0)),   # value tile
    ]
    inputs = [q, k, v]
    if has_mask:
        mask3 = mask.astype(jnp.float32).reshape(B, 1, S)
        in_specs.append(pl.BlockSpec((bt, 1, ts), lambda b, s: (b, 0, s)))
        inputs.append(mask3)

    kernel = _make_attention_kernel(inv_scale, causal and T == S, has_mask, ts, precise)

    grid_spec = pltpu.PrefetchScalarGridSpec(
        num_scalar_prefetch=0,
        grid=grid,
        in_specs=in_specs,
        out_specs=pl.BlockSpec((bt, T, Dv), lambda b, s: (b, 0, 0)),
        scratch_shapes=[
            pltpu.VMEM((bt, T, 1), jnp.float32),    # running max m
            pltpu.VMEM((bt, T, 1), jnp.float32),    # running denom l
            pltpu.VMEM((bt, T, Dv), jnp.float32),   # running numerator acc
        ],
    )

    return pl.pallas_call(
        kernel,
        out_shape=jax.ShapeDtypeStruct((B, T, Dv), compute_dtype),
        grid_spec=grid_spec,
        compiler_params=pltpu.CompilerParams(
            dimension_semantics=("parallel", "arbitrary"),
            vmem_limit_bytes=vmem_limit),
    )(*inputs)


def attention_reference(query, key, value, mask=None, *, causal=False, d_key=None):
    """Pure-JAX reference mirroring the PyTorch module."""
    B, T, Dk = query.shape
    S = key.shape[1]
    if d_key is None:
        d_key = Dk
    scale = math.sqrt(d_key)
    dots = jnp.einsum('btd,bsd->bts', query, key)
    if causal and T == S:
        tri = jnp.triu(jnp.ones((T, S), jnp.float32), 1) * INF
        dots = dots - tri[None, :, :]
    if mask is not None:
        dots = dots - (1.0 - mask[:, None, :]) * INF
    probs = jax.nn.softmax(dots / scale, axis=-1)
    return jnp.einsum('bts,bsd->btd', probs, value)


if __name__ == "__main__":
    B, T, S, D = 4, 8, 16, 32

    root = jax.random.PRNGKey(0)
    kq, kk, kv, kq2 = jax.random.split(root, 4)
    query = jax.random.normal(kq, (B, T, D), jnp.float32)
    key = jax.random.normal(kk, (B, S, D), jnp.float32)
    value = jax.random.normal(kv, (B, S, D), jnp.float32)

    # 0/1 source-padding mask with per-example lengths
    src_lens = jnp.array([16, 12, 9, 5])
    mask_src = (jnp.arange(S)[None, :] < src_lens[:, None]).astype(jnp.float32)

    # --- f32 path: cross-attention (non-causal), T != S, tight tolerance ---
    out = attention_forward(query, key, value, mask_src, causal=False,
                            compute_dtype=jnp.float32)
    out = jax.block_until_ready(out)
    ref = attention_reference(query, key, value, mask_src, causal=False)
    assert out.shape == (B, T, D)
    assert jnp.allclose(out, ref, atol=1e-3, rtol=1e-3), (
        f"cross-attn max abs err {jnp.max(jnp.abs(out - ref))}")

    # --- f32 path: causal self-attention, T == S (exercises the triu path) ---
    query2 = jax.random.normal(kq2, (B, S, D), jnp.float32)
    out2 = attention_forward(query2, key, value, mask_src, causal=True,
                             compute_dtype=jnp.float32)
    out2 = jax.block_until_ready(out2)
    ref2 = attention_reference(query2, key, value, mask_src, causal=True)
    assert jnp.allclose(out2, ref2, atol=1e-3, rtol=1e-3), (
        f"causal max abs err {jnp.max(jnp.abs(out2 - ref2))}")

    # --- default bf16 I/O path (loose sanity bound vs f32 reference) ---
    out3 = attention_forward(query, key, value, mask_src, causal=False)
    out3 = jax.block_until_ready(out3)
    assert out3.dtype == jnp.bfloat16
    err3 = jnp.max(jnp.abs(out3.astype(jnp.float32) - ref))
    assert err3 < 1e-1, f"bf16 path max abs err {err3}"

    # --- mask=None specialization (no mask DMA stream, no select) ---
    out4 = attention_forward(query, key, value, None, causal=False,
                             compute_dtype=jnp.float32)
    out4 = jax.block_until_ready(out4)
    ref4 = attention_reference(query, key, value, None, causal=False)
    assert jnp.allclose(out4, ref4, atol=1e-3, rtol=1e-3), (
        f"unmasked max abs err {jnp.max(jnp.abs(out4 - ref4))}")

    print("KERNEL_OK")
</pallas_src>

<mosaic_0001>
module attributes {stable_mosaic.version = 11 : i64} {
  func.func @kernel(%arg0: i32, %arg1: i32, %arg2: memref<4x8x32xf32, #tpu.memory_space<vmem>>, %arg3: memref<4x16x32xf32, #tpu.memory_space<vmem>>, %arg4: memref<4x16x32xf32, #tpu.memory_space<vmem>>, %arg5: memref<4x1x16xf32, #tpu.memory_space<vmem>>, %arg6: memref<4x8x32xf32, #tpu.memory_space<vmem>>, %arg7: memref<4x8x1xf32, #tpu.memory_space<vmem>>, %arg8: memref<4x8x1xf32, #tpu.memory_space<vmem>>, %arg9: memref<4x8x32xf32, #tpu.memory_space<vmem>>) attributes {dimension_semantics = [#tpu.dimension_semantics<parallel>, #tpu.dimension_semantics<arbitrary>], iteration_bounds = array<i64: 1, 1>, scalar_prefetch = 0 : i64, scratch_operands = 3 : i64, tpu.core_type = #tpu.core_type<tc>, window_params = [{transform_indices = @transform_0, window_bounds = array<i64: 4, 8, 32>}, {transform_indices = @transform_1, window_bounds = array<i64: 4, 16, 32>}, {transform_indices = @transform_2, window_bounds = array<i64: 4, 16, 32>}, {transform_indices = @transform_3, window_bounds = array<i64: 4, 1, 16>}, {transform_indices = @transform_4, window_bounds = array<i64: 4, 8, 32>}]} {
    %c0_i32 = arith.constant 0 : i32
    %0 = arith.cmpi eq, %arg1, %c0_i32 : i32
    %1 = arith.extui %0 : i1 to i32
    %c0_i32_0 = arith.constant 0 : i32
    %2 = arith.cmpi ne, %1, %c0_i32_0 : i32
    scf.if %2 {
      %cst_38 = arith.constant 0xFF800000 : f32
      %41 = vector.broadcast %cst_38 : f32 to vector<4x8x1xf32>
      %c0_39 = arith.constant 0 : index
      %c0_40 = arith.constant 0 : index
      %c0_41 = arith.constant 0 : index
      %42 = vector.load %arg7[%c0_39, %c0_40, %c0_41] : memref<4x8x1xf32, #tpu.memory_space<vmem>>, vector<4x8x1xf32>
      tpu.vector_store %arg7[%c0_39, %c0_40, %c0_41], %41 {strides = array<i32>} : memref<4x8x1xf32, #tpu.memory_space<vmem>>, vector<4x8x1xf32>,
      %cst_42 = arith.constant 0.000000e+00 : f32
      %43 = vector.broadcast %cst_42 : f32 to vector<4x8x1xf32>
      %c0_43 = arith.constant 0 : index
      %c0_44 = arith.constant 0 : index
      %c0_45 = arith.constant 0 : index
      %44 = vector.load %arg8[%c0_43, %c0_44, %c0_45] : memref<4x8x1xf32, #tpu.memory_space<vmem>>, vector<4x8x1xf32>
      tpu.vector_store %arg8[%c0_43, %c0_44, %c0_45], %43 {strides = array<i32>} : memref<4x8x1xf32, #tpu.memory_space<vmem>>, vector<4x8x1xf32>,
      %cst_46 = arith.constant 0.000000e+00 : f32
      %45 = vector.broadcast %cst_46 : f32 to vector<4x8x32xf32>
      %c0_47 = arith.constant 0 : index
      %c0_48 = arith.constant 0 : index
      %c0_49 = arith.constant 0 : index
      %46 = vector.load %arg9[%c0_47, %c0_48, %c0_49] : memref<4x8x32xf32, #tpu.memory_space<vmem>>, vector<4x8x32xf32>
      tpu.vector_store %arg9[%c0_47, %c0_48, %c0_49], %45 {strides = array<i32>} : memref<4x8x32xf32, #tpu.memory_space<vmem>>, vector<4x8x32xf32>,
    } else {
    }
    %c0 = arith.constant 0 : index
    %c0_1 = arith.constant 0 : index
    %c0_2 = arith.constant 0 : index
    %3 = vector.load %arg2[%c0, %c0_1, %c0_2] : memref<4x8x32xf32, #tpu.memory_space<vmem>>, vector<4x8x32xf32>
    %cst = arith.constant 0.176776692 : f32
    %4 = vector.broadcast %cst : f32 to vector<4x8x32xf32>
    %5 = arith.mulf %3, %4 : vector<4x8x32xf32>
    %c0_3 = arith.constant 0 : index
    %c0_4 = arith.constant 0 : index
    %c0_5 = arith.constant 0 : index
    %6 = vector.load %arg3[%c0_3, %c0_4, %c0_5] : memref<4x16x32xf32, #tpu.memory_space<vmem>>, vector<4x16x32xf32>
    %c0_6 = arith.constant 0 : index
    %c0_7 = arith.constant 0 : index
    %c0_8 = arith.constant 0 : index
    %7 = vector.load %arg4[%c0_6, %c0_7, %c0_8] : memref<4x16x32xf32, #tpu.memory_space<vmem>>, vector<4x16x32xf32>
    "tpu.trace_start"() <{level = 10 : i32, message = "btd,bsd->bts"}> : () -> ()
    %cst_9 = arith.constant dense<0.000000e+00> : vector<4x8x16xf32>
    %8 = tpu.matmul %5, %6, %cst_9 {dimension_numbers = #tpu.dot_dimension_numbers<[2], [2], [1], [1], [0, 0, 0, 1, 1, 1], [0], [0]>} : vector<4x8x32xf32>, vector<4x16x32xf32>, vector<4x8x16xf32> -> vector<4x8x16xf32>
    "tpu.trace_stop"() : () -> ()
    %c0_10 = arith.constant 0 : index
    %c0_11 = arith.constant 0 : index
    %c0_12 = arith.constant 0 : index
    %9 = vector.load %arg5[%c0_10, %c0_11, %c0_12] : memref<4x1x16xf32, #tpu.memory_space<vmem>>, vector<4x1x16xf32>
    %cst_13 = arith.constant 0.000000e+00 : f32
    %10 = vector.broadcast %cst_13 : f32 to vector<4x1x16xf32>
    %11 = arith.cmpf ogt, %9, %10 : vector<4x1x16xf32>
    %cst_14 = arith.constant -1.000000e+10 : f32
    %12 = vector.shape_cast %11 : vector<4x1x16xi1> to vector<4x1x16xi1>
    %13 = vector.broadcast %12 : vector<4x1x16xi1> to vector<4x8x16xi1>
    %14 = vector.broadcast %cst_14 : f32 to vector<4x8x16xf32>
    %15 = arith.select %13, %8, %14 : vector<4x8x16xi1>, vector<4x8x16xf32>
    %c0_15 = arith.constant 0 : index
    %c0_16 = arith.constant 0 : index
    %c0_17 = arith.constant 0 : index
    %16 = vector.load %arg7[%c0_15, %c0_16, %c0_17] : memref<4x8x1xf32, #tpu.memory_space<vmem>>, vector<4x8x1xf32>
    %cst_18 = arith.constant dense<0xFF800000> : vector<4x8xf32>
    %17 = vector.multi_reduction <maximumf>, %15, %cst_18 [2] : vector<4x8x16xf32> to vector<4x8xf32>
    %18 = vector.shape_cast %17 : vector<4x8xf32> to vector<4x8x1xf32>
    %19 = arith.maximumf %16, %18 : vector<4x8x1xf32>
    %20 = arith.subf %16, %19 : vector<4x8x1xf32>
    %21 = math.exp %20 : vector<4x8x1xf32>
    %22 = vector.broadcast %19 : vector<4x8x1xf32> to vector<4x8x16xf32>
    %23 = arith.subf %15, %22 : vector<4x8x16xf32>
    %24 = math.exp %23 : vector<4x8x16xf32>
    %c0_19 = arith.constant 0 : index
    %c0_20 = arith.constant 0 : index
    %c0_21 = arith.constant 0 : index
    %25 = vector.load %arg8[%c0_19, %c0_20, %c0_21] : memref<4x8x1xf32, #tpu.memory_space<vmem>>, vector<4x8x1xf32>
    %26 = arith.mulf %21, %25 : vector<4x8x1xf32>
    %cst_22 = arith.constant dense<0.000000e+00> : vector<4x8xf32>
    %27 = vector.multi_reduction <add>, %24, %cst_22 [2] : vector<4x8x16xf32> to vector<4x8xf32>
    %28 = vector.shape_cast %27 : vector<4x8xf32> to vector<4x8x1xf32>
    %29 = arith.addf %26, %28 : vector<4x8x1xf32>
    %c0_23 = arith.constant 0 : index
    %c0_24 = arith.constant 0 : index
    %c0_25 = arith.constant 0 : index
    %30 = vector.load %arg8[%c0_23, %c0_24, %c0_25] : memref<4x8x1xf32, #tpu.memory_space<vmem>>, vector<4x8x1xf32>
    tpu.vector_store %arg8[%c0_23, %c0_24, %c0_25], %29 {strides = array<i32>} : memref<4x8x1xf32, #tpu.memory_space<vmem>>, vector<4x8x1xf32>,
    "tpu.trace_start"() <{level = 10 : i32, message = "bts,bsd->btd"}> : () -> ()
    %cst_26 = arith.constant dense<0.000000e+00> : vector<4x8x32xf32>
    %31 = tpu.matmul %24, %7, %cst_26 {dimension_numbers = #tpu.dot_dimension_numbers<[2], [1], [1], [2], [0, 0, 0, 1, 1, 2], [0], [0]>} : vector<4x8x16xf32>, vector<4x16x32xf32>, vector<4x8x32xf32> -> vector<4x8x32xf32>
    "tpu.trace_stop"() : () -> ()
    %c0_27 = arith.constant 0 : index
    %c0_28 = arith.constant 0 : index
    %c0_29 = arith.constant 0 : index
    %32 = vector.load %arg9[%c0_27, %c0_28, %c0_29] : memref<4x8x32xf32, #tpu.memory_space<vmem>>, vector<4x8x32xf32>
    %33 = vector.broadcast %21 : vector<4x8x1xf32> to vector<4x8x32xf32>
    %34 = arith.mulf %33, %32 : vector<4x8x32xf32>
    %35 = arith.addf %34, %31 : vector<4x8x32xf32>
    %c0_30 = arith.constant 0 : index
    %c0_31 = arith.constant 0 : index
    %c0_32 = arith.constant 0 : index
    %36 = vector.load %arg9[%c0_30, %c0_31, %c0_32] : memref<4x8x32xf32, #tpu.memory_space<vmem>>, vector<4x8x32xf32>
    tpu.vector_store %arg9[%c0_30, %c0_31, %c0_32], %35 {strides = array<i32>} : memref<4x8x32xf32, #tpu.memory_space<vmem>>, vector<4x8x32xf32>,
    %c0_33 = arith.constant 0 : index
    %c0_34 = arith.constant 0 : index
    %c0_35 = arith.constant 0 : index
    %37 = vector.load %arg7[%c0_33, %c0_34, %c0_35] : memref<4x8x1xf32, #tpu.memory_space<vmem>>, vector<4x8x1xf32>
    tpu.vector_store %arg7[%c0_33, %c0_34, %c0_35], %19 {strides = array<i32>} : memref<4x8x1xf32, #tpu.memory_space<vmem>>, vector<4x8x1xf32>,
    %c0_i32_36 = arith.constant 0 : i32
    %38 = arith.cmpi eq, %arg1, %c0_i32_36 : i32
    %39 = arith.extui %38 : i1 to i32
    %c0_i32_37 = arith.constant 0 : i32
    %40 = arith.cmpi ne, %39, %c0_i32_37 : i32
    scf.if %40 {
      %c0_38 = arith.constant 0 : index
      %c0_39 = arith.constant 0 : index
      %c0_40 = arith.constant 0 : index
      %41 = vector.load %arg8[%c0_38, %c0_39, %c0_40] : memref<4x8x1xf32, #tpu.memory_space<vmem>>, vector<4x8x1xf32>
      %42 = tpu.reciprocal %41 {approx = true} : vector<4x8x1xf32> -> vector<4x8x1xf32>
      %43 = arith.mulf %41, %42 : vector<4x8x1xf32>
      %cst_41 = arith.constant 2.000000e+00 : f32
      %44 = vector.broadcast %cst_41 : f32 to vector<4x8x1xf32>
      %45 = arith.subf %44, %43 : vector<4x8x1xf32>
      %46 = arith.mulf %42, %45 : vector<4x8x1xf32>
      %c0_42 = arith.constant 0 : index
      %c0_43 = arith.constant 0 : index
      %c0_44 = arith.constant 0 : index
      %47 = vector.load %arg9[%c0_42, %c0_43, %c0_44] : memref<4x8x32xf32, #tpu.memory_space<vmem>>, vector<4x8x32xf32>
      %48 = vector.broadcast %46 : vector<4x8x1xf32> to vector<4x8x32xf32>
      %49 = arith.mulf %47, %48 : vector<4x8x32xf32>
      %c0_45 = arith.constant 0 : index
      %c0_46 = arith.constant 0 : index
      %c0_47 = arith.constant 0 : index
      %50 = vector.load %arg6[%c0_45, %c0_46, %c0_47] : memref<4x8x32xf32, #tpu.memory_space<vmem>>, vector<4x8x32xf32>
      tpu.vector_store %arg6[%c0_45, %c0_46, %c0_47], %49 {strides = array<i32>} : memref<4x8x32xf32, #tpu.memory_space<vmem>>, vector<4x8x32xf32>,
    } else {
    }
    return
  }
  func.func @transform_0(%arg0: i32, %arg1: i32) -> (i32, i32, i32) {
    %c0_i32 = arith.constant 0 : i32
    %c0_i32_0 = arith.constant 0 : i32
    %c0_i32_1 = arith.constant 0 : i32
    return %arg0, %c0_i32, %c0_i32_0 : i32, i32, i32
  }
  func.func @transform_1(%arg0: i32, %arg1: i32) -> (i32, i32, i32) {
    %c0_i32 = arith.constant 0 : i32
    %c0_i32_0 = arith.constant 0 : i32
    return %arg0, %arg1, %c0_i32 : i32, i32, i32
  }
  func.func @transform_2(%arg0: i32, %arg1: i32) -> (i32, i32, i32) {
    %c0_i32 = arith.constant 0 : i32
    %c0_i32_0 = arith.constant 0 : i32
    return %arg0, %arg1, %c0_i32 : i32, i32, i32
  }
  func.func @transform_3(%arg0: i32, %arg1: i32) -> (i32, i32, i32) {
    %c0_i32 = arith.constant 0 : i32
    %c0_i32_0 = arith.constant 0 : i32
    return %arg0, %c0_i32, %arg1 : i32, i32, i32
  }
  func.func @transform_4(%arg0: i32, %arg1: i32) -> (i32, i32, i32) {
    %c0_i32 = arith.constant 0 : i32
    %c0_i32_0 = arith.constant 0 : i32
    %c0_i32_1 = arith.constant 0 : i32
    return %arg0, %c0_i32, %c0_i32_0 : i32, i32, i32
  }
}

</mosaic_0001>

<bundles_post_ra>
// kernel: tpu_custom_call.1
= control target key start
LH: loop header
LB: loop body
LE: loop exit
PB: predicated region body
PF: predicated region fallthrough
CT: control target
= control target key end

     0   :  { %9 = vsyncpa [#allocation6], 0  ;;  %s905_s0 = inlined_call_operand.hbm [shape: f32[4,8,32], index: 0, kind: input, shape index: {}]   ;;  %s906_s1 = inlined_call_operand.hbm [shape: f32[4,16,32], index: 1, kind: input, shape index: {}]   ;;  %s907_s2 = inlined_call_operand.hbm [shape: f32[4,16,32], index: 2, kind: input, shape index: {}]   ;;  %s908_s3 = inlined_call_operand.hbm [shape: f32[4,1,16], index: 3, kind: input, shape index: {}]   ;;  %s909_s4 = inlined_call_operand.hbm [shape: f32[4,8,32], index: 4, kind: output, shape index: {}]  }
   0x1   :  { %10 = vsyncpa [#allocation9], 0 }
   0x2   :  { %11 = vsyncpa [#allocation12], 0 }
   0x3   :  { %12 = vsyncpa [#allocation7], 0  ;;  %s30_s17 = sshll.u32 %s906_s1, 4  ;;  %s749_s18 = smov [#allocation8]   ;;  %s31_s17 = int_to_ptr.hbm [resolvable:$true] %s30_s17 }
   0x4   :  { %s32_s19 = sshll.u32 %s749_s18, 4  ;;  %s17_s22 = sshll.u32 %s905_s0, 4  ;;  %s33_s19 = int_to_ptr.vmem [resolvable:$true] %s32_s19  ;;  %s18_s22 = int_to_ptr.hbm [resolvable:$true] %s17_s22 }
   0x5   :  { %s750_s23 = smov 128   ;;  %s751_s24 = smov 8  }
   0x6   :  { %38 = dma.hbm_to_vmem [thread:$0]  %s31_s17, 1024, %s33_s19, [#allocation9], %s750_s23, %s750_s23, %s751_s24  }
   0x7   :  { %s752_s25 = smov [#allocation5]   ;;  %s43_s1 = sshll.u32 %s907_s2, 4  ;;  %s44_s1 = int_to_ptr.hbm [resolvable:$true] %s43_s1 }
   0x8   :  { %s19_s26 = sshll.u32 %s752_s25, 4  ;;  %s56_s30 = sshll.u32 %s908_s3, 4  ;;  %s20_s26 = int_to_ptr.vmem [resolvable:$true] %s19_s26  ;;  %s57_s30 = int_to_ptr.hbm [resolvable:$true] %s56_s30 }
   0x9   :  { %25 = dma.hbm_to_vmem [thread:$0]  %s18_s22, 512, %s20_s26, [#allocation6], %s750_s23, %s750_s23, %s751_s24  }
   0xa   :  { %s753_s5 = smov [#allocation10]   ;;  %s754_s7 = smov [#allocation11]  }
   0xb   :  { %s45_s6 = sshll.u32 %s753_s5, 4  ;;  %s58_s2 = sshll.u32 %s754_s7, 4  ;;  %s46_s6 = int_to_ptr.vmem [resolvable:$true] %s45_s6  ;;  %s59_s2 = int_to_ptr.vmem [resolvable:$true] %s58_s2 }
   0xc   :  { %51 = dma.hbm_to_vmem [thread:$0]  %s44_s1, 1024, %s46_s6, [#allocation9], %s750_s23, %s750_s23, %s751_s24  }
   0xd   :  { %s755_s8 = smov 16   ;;  %s756_s9 = smov 1  }
   0xe   :  { %64 = dma.hbm_to_vmem [thread:$0]  %s57_s30, 64, %s59_s2, [#allocation12], %s755_s8, %s755_s8, %s756_s9  }
   0xf   :  { %741 = dma.done.wait [#allocation6], 512  }
  0x10   :  { %742 = vsyncadd [#allocation6], 4294966784 }
  0x11   :  { %743 = dma.done.wait [#allocation9], 2048  }
  0x12   :  { %744 = vsyncadd [#allocation9], 4294965248 }
  0x13   :  { %745 = dma.done.wait [#allocation12], 64  }
  0x14   :  { %746 = vsyncadd [#allocation12], 4294967232  ;;  %vm94_vm0 = vcmask 261120   ;;  %v108_v0 = vld [vmem:[#allocation8 + $0x8] sm:$0xff]  ;;  %v107_v2 = vld [vmem:[#allocation8] sm:$0xff]  ;;  %v757_v16 = vmov 0  }
  0x15   :  { %v112_v1 = vld [vmem:[#allocation8 + $0x28] sm:$0xff]  ;;  %566 = vmatpush.xpose.msk.msra.mxu0 %vm94_vm0, %v108_v0  ;;  %v99_v3 = vld [vmem:[#allocation5] sm:$0xff]  ;;  %v101_v4 = vld [vmem:[#allocation5 + $0x10] sm:$0xff]  ;;  %594 = vset.pattern.permute.xlu0 %v757_v16  ;;  %vm85_vm1 = vcmask 7168   ;;  %v758_v18 = vmov -inf   ;;  %vm268_vm7 = vcmask 130048  }
  0x16   :  { %572 = vmatpush.xpose.msk.msra.mxu2 %vm94_vm0, %v112_v1  ;;  %v111_v5 = vld [vmem:[#allocation8 + $0x20] sm:$0xff]  ;;  %v110_v6 = vld [vmem:[#allocation8 + $0x18] sm:$0xff]  ;;  %v103_v8 = vmul.f32 0.17677669, %v99_v3  ;;  %v100_v9 = vld [vmem:[#allocation5 + $0x8] sm:$0xff]  ;;  %596 = vset.pattern.permute.xlu2 %v757_v16  ;;  %86 = vst.msk [vmem:[#allocation2] sm:$0xff] %vm85_vm1, %v758_v18 }
  0x17   :  { %v114_v7 = vld [vmem:[#allocation8 + $0x38] sm:$0xff]  ;;  %569 = vmatpush.xpose.msk.msra.mxu1 %vm94_vm0, %v110_v6  ;;  %v105_v10 = vmul.f32 0.17677669, %v101_v4  ;;  %v109_v11 = vld [vmem:[#allocation8 + $0x10] sm:$0xff]  ;;  %v104_v14 = vmul.f32 0.17677669, %v100_v9  ;;  %595 = vset.pattern.permute.xlu1 %v757_v16 }
  0x18   :  { %575 = vmatpush.xpose.msk.msra.mxu3 %vm94_vm0, %v114_v7  ;;  %v113_v12 = vld [vmem:[#allocation8 + $0x30] sm:$0xff]  ;;  %v102_v13 = vld [vmem:[#allocation5 + $0x18] sm:$0xff]  ;;  %v240_v17 = vld [vmem:[#allocation11] sm:$0x1]  ;;  %87 = vst.msk [vmem:[#allocation2 + $0x8] sm:$0xff] %vm85_vm1, %v758_v18  ;;  %v759_v42 = vmov 0.0  }
  0x19   :  { %567 = vmatpush.xpose.msk.msra.mxu0 %vm94_vm0, %v107_v2  ;;  %v106_v15 = vmul.f32 0.17677669, %v102_v13  ;;  %vm244_vm2 = vcmp.gt.f32.partialorder %v240_v17, 0.0  ;;  %88 = vst.msk [vmem:[#allocation2 + $0x10] sm:$0xff] %vm85_vm1, %v758_v18  ;;  %v241_v19 = vld [vmem:[#allocation11 + $0x1] sm:$0x1] }
  0x1a   :  { %573 = vmatpush.xpose.msk.msra.mxu2 %vm94_vm0, %v111_v5  ;;  %89 = vst.msk [vmem:[#allocation2 + $0x18] sm:$0xff] %vm85_vm1, %v758_v18  ;;  %v248_v20 = vsel %vm244_vm2, 1, %v757_v16  ;;  %v242_v21 = vld [vmem:[#allocation11 + $0x2] sm:$0x1]  ;;  %vm245_vm3 = vcmp.gt.f32.partialorder %v241_v19, 0.0  ;;  %v120_v59 = vld [vmem:[#allocation10 + $0x28] sm:$0xff] }
  0x1b   :  { %570 = vmatpush.xpose.msk.msra.mxu1 %vm94_vm0, %v109_v11  ;;  %v252_v22 = vperm.slane %v248_v20, 0  ;;  %vm246_vm4 = vcmp.gt.f32.partialorder %v242_v21, 0.0  ;;  %v249_v23 = vsel %vm245_vm3, 1, %v757_v16  ;;  %v243_v24 = vld [vmem:[#allocation11 + $0x3] sm:$0x1]  ;;  %92 = vst.msk [vmem:[#allocation3 + $0x10] sm:$0xff] %vm85_vm1, %v759_v42 }
  0x1c   :  { %576 = vmatpush.xpose.msk.msra.mxu3 %vm94_vm0, %v113_v12  ;;  %568 = vmatmul.msk.f32.vlgmr.msra.gmra.mxu0 %vm94_vm0, %v103_v8  ;;  %v250_v25 = vsel %vm246_vm4, 1, %v757_v16  ;;  %v253_v26 = vperm.slane %v249_v23, 0  ;;  %vm247_vm6 = vcmp.gt.f32.partialorder %v243_v24, 0.0  ;;  %90 = vst.msk [vmem:[#allocation3] sm:$0xff] %vm85_vm1, %v759_v42  ;;  %v119_v60 = vld [vmem:[#allocation10 + $0x20] sm:$0xff]  ;;  %v122_v61 = vld [vmem:[#allocation10 + $0x38] sm:$0xff] }
  0x1d   :  { %574 = vmatmul.msk.f32.vlgmr.msra.gmra.mxu2 %vm94_vm0, %v105_v10  ;;  %vm256_vm5 = vcmp.eq.s32.totalorder %v252_v22, 1  ;;  %v254_v28 = vperm.slane %v250_v25, 0  ;;  %v251_v30 = vsel %vm247_vm6, 1, %v757_v16  ;;  %91 = vst.msk [vmem:[#allocation3 + $0x8] sm:$0xff] %vm85_vm1, %v759_v42  ;;  %v841_v43 = vld [vmem:[#allocation2] sm:$0xff]  ;;  %v121_v62 = vld [vmem:[#allocation10 + $0x30] sm:$0xff] }
  0x1e   :  { %571 = vmatmul.msk.f32.vlgmr.msra.gmra.mxu1 %vm94_vm0, %v104_v14  ;;  %vm257_vm8 = vcmp.eq.s32.totalorder %v253_v26, 1  ;;  %v255_v33 = vperm.slane %v251_v30, 0  ;;  %93 = vst.msk [vmem:[#allocation3 + $0x18] sm:$0xff] %vm85_vm1, %v759_v42  ;;  %421 = vmatpush.msrb.mxu2 %v120_v59  ;;  %v116_v63 = vld [vmem:[#allocation10 + $0x8] sm:$0xff]  ;;  %v115_v0 = vld [vmem:[#allocation10] sm:$0xff]  ;;  %v118_v1 = vld [vmem:[#allocation10 + $0x18] sm:$0xff] }
  0x1f   :  { %577 = vmatmul.msk.f32.vlgmr.msra.gmra.mxu3 %vm94_vm0, %v106_v15  ;;  %vm258_vm9 = vcmp.eq.s32.totalorder %v254_v28, 1  ;;  %95 = vst.msk [vmem:[#allocation4] sm:$0xff] %vm94_vm0, %v759_v42  ;;  %v853_v49 = vld [vmem:[#allocation2 + $0x8] sm:$0xff]  ;;  %375 = vmatpush.msrb.mxu0 %v116_v63  ;;  %v117_v2 = vld [vmem:[#allocation10 + $0x10] sm:$0xff]  ;;  %s760_s3 = smov [#allocation13]   ;;  %s551_s13 = sshll.u32 %s909_s4, 4  ;;  %s552_s13 = int_to_ptr.hbm [resolvable:$true] %s551_s13 }
  0x20   :  { %vm259_vm10 = vcmp.eq.s32.totalorder %v255_v33, 1  ;;  %96 = vst.msk [vmem:[#allocation4 + $0x8] sm:$0xff] %vm94_vm0, %v759_v42  ;;  %v851_v47 = vld [vmem:[#allocation2 + $0x10] sm:$0xff]  ;;  %422 = vmatpush.msrb.mxu2 %v119_v60  ;;  %444 = vmatpush.msrb.mxu3 %v122_v61  ;;  %s549_s10 = sshll.u32 %s760_s3, 4  ;;  %s550_s10 = int_to_ptr.vmem [resolvable:$true] %s549_s10 }
  0x21   :  { %97 = vst.msk [vmem:[#allocation4 + $0x10] sm:$0xff] %vm94_vm0, %v759_v42  ;;  %v866_v55 = vld [vmem:[#allocation2 + $0x18] sm:$0xff]  ;;  %376 = vmatpush.msrb.mxu0 %v115_v0  ;;  %398 = vmatpush.msrb.mxu1 %v118_v1 }
  0x22   :  { %98 = vst.msk [vmem:[#allocation4 + $0x18] sm:$0xff] %vm94_vm0, %v759_v42  ;;  %445 = vmatpush.msrb.mxu3 %v121_v62  ;;  %v331_v30 = vld [vmem:[#allocation3 + $0x10] sm:$0xff] }
  0x23   :  { %399 = vmatpush.msrb.mxu1 %v117_v2 }
  0x27   :  { %v451_v62 = vld [vmem:[#allocation4 + $0x8] sm:$0xff] }
  0x99   :  { %v150_v27 = vpop.f32.mrf.mxu0 }
  0x9a   :  { %v823_v29 = vsel %vm256_vm5, %v150_v27, -1e+10 }
  0x9b   :  { %v269_v31 = vsel %vm268_vm7, %v823_v29, -inf  ;;  %v179_v32 = vpop.f32.mrf.mxu1 }
  0x9c   :  { %270 = vmax.xlane.f32.xlu1 %v269_v31  ;;  %v827_v34 = vsel %vm257_vm8, %v179_v32, -1e+10 }
  0x9d   :  { %v272_v38 = vsel %vm268_vm7, %v827_v34, -inf }
  0xa0   :  { %v208_v35 = vpop.f32.mrf.mxu2 }
  0xa1   :  { %v262_v36 = vsel %vm258_vm9, %v208_v35, -1e+10 }
  0xa2   :  { %v275_v37 = vsel %vm268_vm7, %v262_v36, -inf  ;;  %v237_v39 = vpop.f32.mrf.mxu3 }
  0xa3   :  { %276 = vmax.xlane.f32.xlu0 %v275_v37  ;;  %v263_v40 = vsel %vm259_vm10, %v237_v39, -1e+10 }
  0xa4   :  { %273 = vmax.xlane.f32.xlu1 %v272_v38  ;;  %v278_v41 = vsel %vm268_vm7, %v263_v40, -inf }
  0xab   :  { %279 = vmax.xlane.f32.xlu0 %v278_v41 }
 0x10f   :  { %v271_v44 = vpop.xlane.xlu1 %270 }
 0x110   :  { %v844_v45 = vmax.f32 %v841_v43, %v271_v44  ;;  %v330_v44 = vld [vmem:[#allocation3 + $0x8] sm:$0xff] }
 0x112   :  { %v285_v46 = vsub.f32 %v841_v43, %v844_v45  ;;  %486 = vst.msk [vmem:[#allocation2] sm:$0xff] %vm85_vm1, %v844_v45  ;;  %299 = vperm.xlu0 %594, %v844_v45   ;;  %v450_v45 = vld [vmem:[#allocation4] sm:$0xff] }
 0x114   :  { %v289_v22 = vmul.f32 1.442695, %v285_v46 }
 0x116   :  { %v277_v48 = vpop.xlane.xlu0 %276 }
 0x117   :  { %v856_v50 = vmax.f32 %v851_v47, %v277_v48  ;;  %v274_v51 = vpop.xlane.xlu1 %273 }
 0x118   :  { %v282_v53 = vmax.f32 %v853_v49, %v274_v51 }
 0x119   :  { %v287_v52 = vsub.f32 %v851_v47, %v856_v50  ;;  %488 = vst.msk [vmem:[#allocation2 + $0x10] sm:$0xff] %vm85_vm1, %v856_v50  ;;  %309 = vperm.xlu2 %596, %v856_v50  }
 0x11a   :  { %v286_v54 = vsub.f32 %v853_v49, %v282_v53  ;;  %487 = vst.msk [vmem:[#allocation2 + $0x8] sm:$0xff] %vm85_vm1, %v282_v53  ;;  %304 = vperm.xlu1 %595, %v282_v53  }
 0x11b   :  { %v293_v27 = vmul.f32 1.442695, %v287_v52 }
 0x11c   :  { %v291_v23 = vmul.f32 1.442695, %v286_v54 }
 0x11e   :  { %v280_v56 = vpop.xlane.xlu0 %279 }
 0x11f   :  { %v284_v57 = vmax.f32 %v866_v55, %v280_v56 }
 0x121   :  { %v288_v58 = vsub.f32 %v866_v55, %v284_v57  ;;  %489 = vst.msk [vmem:[#allocation2 + $0x18] sm:$0xff] %vm85_vm1, %v284_v57  ;;  %314 = vperm.xlu2 %596, %v284_v57  }
 0x123   :  { %v295_v28 = vmul.f32 1.442695, %v288_v58 }
 0x173   :  { %v310_v3 = vpop.permute.xlu2 %309 }
 0x174   :  { %v319_v4 = vsub.f32 %v262_v36, %v310_v3  ;;  %v329_v36 = vld [vmem:[#allocation3] sm:$0xff] }
 0x176   :  { %v325_v5 = vmul.f32 1.442695, %v319_v4  ;;  %v332_v4 = vld [vmem:[#allocation3 + $0x18] sm:$0xff] }
 0x178   :  { %597 = vpow2.f32 %v325_v5 }
 0x17b   :  { %v315_v6 = vpop.permute.xlu2 %314 }
 0x17c   :  { %v320_v7 = vsub.f32 %v263_v40, %v315_v6 }
 0x17e   :  { %v598_v8 = vpop.eup %597  ;;  %v327_v9 = vmul.f32 1.442695, %v320_v7 }
 0x17f   :  { %580 = vmatmul.msk.f32.vlgmr.msrb.gmra.mxu2 %vm268_vm7, %v598_v8  ;;  %v343_v10 = vsel %vm268_vm7, %v598_v8, 0.0  ;;  %v452_v8 = vld [vmem:[#allocation4 + $0x10] sm:$0xff] }
 0x180   :  { %599 = vpow2.f32 %v327_v9  ;;  %344 = vadd.xlane.f32.xlu0 %v343_v10 }
 0x184   :  { %v300_v11 = vpop.permute.xlu0 %299 }
 0x185   :  { %v317_v13 = vsub.f32 %v823_v29, %v300_v11 }
 0x186   :  { %v600_v12 = vpop.eup %599 }
 0x187   :  { %581 = vmatmul.msk.f32.vlgmr.msrb.gmra.mxu3 %vm268_vm7, %v600_v12  ;;  %v321_v14 = vmul.f32 1.442695, %v317_v13  ;;  %v346_v26 = vsel %vm268_vm7, %v600_v12, 0.0 }
 0x189   :  { %601 = vpow2.f32 %v321_v14  ;;  %v453_v14 = vld [vmem:[#allocation4 + $0x18] sm:$0xff] }
 0x18c   :  { %v305_v15 = vpop.permute.xlu1 %304 }
 0x18d   :  { %v318_v16 = vsub.f32 %v827_v34, %v305_v15 }
 0x18f   :  { %v602_v17 = vpop.eup %601  ;;  %v323_v18 = vmul.f32 1.442695, %v318_v16 }
 0x190   :  { %578 = vmatmul.msk.f32.vlgmr.msrb.gmra.mxu0 %vm268_vm7, %v602_v17  ;;  %v337_v19 = vsel %vm268_vm7, %v602_v17, 0.0 }
 0x191   :  { %603 = vpow2.f32 %v323_v18  ;;  %338 = vadd.xlane.f32.xlu2 %v337_v19 }
 0x192   :  { %605 = vpow2.f32 %v289_v22 }
 0x193   :  { %607 = vpow2.f32 %v291_v23 }
 0x194   :  { %609 = vpow2.f32 %v293_v27 }
 0x195   :  { %611 = vpow2.f32 %v295_v28 }
 0x197   :  { %v604_v20 = vpop.eup %603 }
 0x198   :  { %579 = vmatmul.msk.f32.vlgmr.msrb.gmra.mxu1 %vm268_vm7, %v604_v20  ;;  %v340_v21 = vsel %vm268_vm7, %v604_v20, 0.0  ;;  %v606_v24 = vpop.eup %605 }
 0x199   :  { %341 = vadd.xlane.f32.xlu1 %v340_v21  ;;  %v608_v25 = vpop.eup %607  ;;  %v333_v38 = vmul.f32 %v606_v24, %v329_v36 }
 0x19a   :  { %v610_v29 = vpop.eup %609  ;;  %v334_v46 = vmul.f32 %v608_v25, %v330_v44 }
 0x19b   :  { %v612_v31 = vpop.eup %611  ;;  %v335_v32 = vmul.f32 %v610_v29, %v331_v30 }
 0x19c   :  { %v336_v5 = vmul.f32 %v612_v31, %v332_v4 }
 0x1a9   :  { %456 = vperm.xlu2 %596, %v606_v24  }
 0x1b2   :  { %461 = vperm.xlu1 %595, %v608_v25  }
 0x1d2   :  { %347 = vadd.xlane.f32.xlu2 %v346_v26 }
 0x1ea   :  { %466 = vperm.xlu2 %596, %v610_v29  }
 0x1f2   :  { %471 = vperm.xlu2 %596, %v612_v31  }
 0x1f3   :  { %v345_v33 = vpop.xlane.xlu0 %344 }
 0x1f4   :  { %v351_v34 = vadd.f32 %v345_v33, %v335_v32 }
 0x1f6   :  { %356 = vst.msk [vmem:[#allocation3 + $0x10] sm:$0xff] %vm85_vm1, %v351_v34 }
 0x1fd   :  { %v495_v35 = vld [vmem:[#allocation3 + $0x10] sm:$0xff] }
 0x1fe   :  { %613 = vrcp.f32 %v495_v35 }
 0x202   :  { %v424_v11 = vpop.f32.mrf.mxu2 }
 0x204   :  { %v614_v37 = vpop.eup %613  ;;  %v339_v39 = vpop.xlane.xlu2 %338 }
 0x205   :  { %v503_v40 = vmul.f32 %v614_v37, %v495_v35  ;;  %v349_v41 = vadd.f32 %v339_v39, %v333_v38 }
 0x207   :  { %v507_v42 = vsub.f32 2.0, %v503_v40  ;;  %354 = vst.msk [vmem:[#allocation3] sm:$0xff] %vm85_vm1, %v349_v41 }
 0x209   :  { %v511_v43 = vmul.f32 %v614_v37, %v507_v42 }
 0x20a   :  { %v447_v18 = vpop.f32.mrf.mxu3 }
 0x20b   :  { %529 = vperm.xlu1 %595, %v511_v43  }
 0x20c   :  { %v342_v47 = vpop.xlane.xlu1 %341  ;;  %v457_v48 = vpop.permute.xlu2 %456 }
 0x20d   :  { %v350_v49 = vadd.f32 %v342_v47, %v334_v46  ;;  %v474_v50 = vmul.f32 %v457_v48, %v450_v45  ;;  %v378_v51 = vpop.f32.mrf.mxu0 }
 0x20e   :  { %v493_v52 = vld [vmem:[#allocation3] sm:$0xff] }
 0x20f   :  { %355 = vst.msk [vmem:[#allocation3 + $0x8] sm:$0xff] %vm85_vm1, %v350_v49  ;;  %v478_v53 = vadd.f32 %v474_v50, %v378_v51  ;;  %615 = vrcp.f32 %v493_v52 }
 0x211   :  { %482 = vst.msk [vmem:[#allocation4] sm:$0xff] %vm94_vm0, %v478_v53 }
 0x215   :  { %v616_v54 = vpop.eup %615  ;;  %v401_v2 = vpop.f32.mrf.mxu1 }
 0x216   :  { %v501_v55 = vmul.f32 %v616_v54, %v493_v52  ;;  %v494_v56 = vld [vmem:[#allocation3 + $0x8] sm:$0xff] }
 0x217   :  { %617 = vrcp.f32 %v494_v56 }
 0x218   :  { %v505_v57 = vsub.f32 2.0, %v501_v55  ;;  %v513_v29 = vld [vmem:[#allocation4] sm:$0xff] }
 0x21a   :  { %v509_v58 = vmul.f32 %v616_v54, %v505_v57 }
 0x21c   :  { %519 = vperm.xlu0 %594, %v509_v58  }
 0x21d   :  { %v618_v59 = vpop.eup %617 }
 0x21e   :  { %v502_v60 = vmul.f32 %v618_v59, %v494_v56 }
 0x220   :  { %v506_v61 = vsub.f32 2.0, %v502_v60 }
 0x222   :  { %v510_v63 = vmul.f32 %v618_v59, %v506_v61 }
 0x224   :  { %v462_v0 = vpop.permute.xlu1 %461  ;;  %524 = vperm.xlu2 %596, %v510_v63  }
 0x225   :  { %v475_v1 = vmul.f32 %v462_v0, %v451_v62 }
 0x227   :  { %v479_v3 = vadd.f32 %v475_v1, %v401_v2 }
 0x229   :  { %483 = vst.msk [vmem:[#allocation4 + $0x8] sm:$0xff] %vm94_vm0, %v479_v3 }
 0x230   :  { %v514_v26 = vld [vmem:[#allocation4 + $0x8] sm:$0xff] }
 0x245   :  { %v348_v6 = vpop.xlane.xlu2 %347 }
 0x246   :  { %v352_v7 = vadd.f32 %v348_v6, %v336_v5 }
 0x248   :  { %357 = vst.msk [vmem:[#allocation3 + $0x18] sm:$0xff] %vm85_vm1, %v352_v7 }
 0x24d   :  { %v467_v9 = vpop.permute.xlu2 %466 }
 0x24e   :  { %v476_v10 = vmul.f32 %v467_v9, %v452_v8 }
 0x24f   :  { %v496_v12 = vld [vmem:[#allocation3 + $0x18] sm:$0xff] }
 0x250   :  { %v480_v13 = vadd.f32 %v476_v10, %v424_v11  ;;  %619 = vrcp.f32 %v496_v12 }
 0x252   :  { %484 = vst.msk [vmem:[#allocation4 + $0x10] sm:$0xff] %vm94_vm0, %v480_v13 }
 0x255   :  { %v472_v15 = vpop.permute.xlu2 %471 }
 0x256   :  { %v620_v16 = vpop.eup %619  ;;  %v477_v17 = vmul.f32 %v472_v15, %v453_v14 }
 0x257   :  { %v504_v19 = vmul.f32 %v620_v16, %v496_v12 }
 0x258   :  { %v481_v20 = vadd.f32 %v477_v17, %v447_v18 }
 0x259   :  { %v508_v21 = vsub.f32 2.0, %v504_v19  ;;  %v515_v24 = vld [vmem:[#allocation4 + $0x10] sm:$0xff] }
 0x25a   :  { %485 = vst.msk [vmem:[#allocation4 + $0x18] sm:$0xff] %vm94_vm0, %v481_v20 }
 0x25b   :  { %v512_v22 = vmul.f32 %v620_v16, %v508_v21 }
 0x25d   :  { %534 = vperm.xlu2 %596, %v512_v22  }
 0x261   :  { %v516_v32 = vld [vmem:[#allocation4 + $0x18] sm:$0xff] }
 0x27d   :  { %v530_v23 = vpop.permute.xlu1 %529 }
 0x27e   :  { %v539_v25 = vmul.f32 %v530_v23, %v515_v24  ;;  %v525_v27 = vpop.permute.xlu2 %524 }
 0x27f   :  { %v538_v28 = vmul.f32 %v525_v27, %v514_v26 }
 0x280   :  { %543 = vst.msk [vmem:[#allocation13 + $0x10] sm:$0xff] %vm94_vm0, %v539_v25 }
 0x281   :  { %542 = vst.msk [vmem:[#allocation13 + $0x8] sm:$0xff] %vm94_vm0, %v538_v28 }
 0x28e   :  { %v520_v30 = vpop.permute.xlu0 %519 }
 0x28f   :  { %v537_v31 = vmul.f32 %v520_v30, %v513_v29 }
 0x291   :  { %541 = vst.msk [vmem:[#allocation13] sm:$0xff] %vm94_vm0, %v537_v31 }
 0x2b7   :  { %v535_v33 = vpop.permute.xlu2 %534 }
 0x2b8   :  { %v540_v34 = vmul.f32 %v535_v33, %v516_v32 }
 0x2ba   :  { %544 = vst.msk [vmem:[#allocation13 + $0x18] sm:$0xff] %vm94_vm0, %v540_v34 }
 0x2bb   :  { %557 = dma.vmem_to_hbm [thread:$0]  %s550_s10, 512, %s552_s13, [#allocation7], %s750_s23, %s750_s23, %s751_s24  }
 0x2bc   :  { %747 = dma.done.wait [#allocation7], 512  }
 0x2bd   :  { %748 = vsyncadd [#allocation7], 4294966784 }
 0x2be   :  { %562 = vsyncpa [#allocation6], 1 }
 0x2bf   :  { %563 = vsyncpa [#allocation9], 1 }
 0x2c0   :  { %564 = vsyncpa [#allocation12], 1 }
 0x2c1   :  { %565 = vsyncpa [#allocation7], 1 }

</bundles_post_ra>
